<compile_context>
chip_gen: v5e
topology: v5e:2x2
jax: 0.10.0
libtpu: 0.0.40
codegen_flags: <defaults>
</compile_context>

<pallas_src>
import math
import functools

import jax
import jax.numpy as jnp
from jax.experimental import pallas as pl
from jax.experimental.pallas import tpu as pltpu


# ----------------------------------------------------------------------------
# Parameter setup (deterministic, mirrors generate_cell_anchors in __init__)
# ----------------------------------------------------------------------------
def generate_cell_anchors(sizes, aspect_ratios):
    anchors = []
    for size in sizes:
        area = float(size) ** 2.0
        for ar in aspect_ratios:
            w = math.sqrt(area / ar)
            h = ar * w
            anchors.append([-w / 2.0, -h / 2.0, w / 2.0, h / 2.0])
    return jnp.asarray(anchors, dtype=jnp.float32)  # (A, 4)


def _round_up(x, m):
    return ((x + m - 1) // m) * m


# ----------------------------------------------------------------------------
# Pallas kernel: one block = (A*4, tq) output columns (tq locations, lanes).
# ----------------------------------------------------------------------------
def _anchor_kernel(shift_ref, base_ref, out_ref, *, num_levels):
    # shift_ref: (3, tq) f32 rows = [x_shift, y_shift, level_id]
    # base_ref : (L, A*4, 1) f32 flattened cell anchors per level
    # out_ref  : (A*4, tq) f32; row r = a*4 + c holds coord c of anchor a
    a4, tq = out_ref.shape

    sx = shift_ref[0:1, :]                                   # (1, tq)
    sy = shift_ref[1:2, :]                                   # (1, tq)

    # Row r = a*4 + c with coords [x0, y0, x1, y1]; c even -> x shift,
    # c odd -> y shift.  Since a*4 is even, parity(r) == parity(c).
    rows = jax.lax.broadcasted_iota(jnp.int32, (a4, tq), 0)
    shift = jnp.where((rows % 2) == 0, sx, sy)               # (a4, tq)

    base = base_ref[0]                                       # (a4, 1)
    if num_levels > 1:
        lvl = jnp.broadcast_to(shift_ref[2:3, :], (a4, tq))  # f32 level ids
        for l in range(1, num_levels):
            base = jnp.where(lvl == jnp.float32(l), base_ref[l], base)

    out_ref[...] = shift + base


# ----------------------------------------------------------------------------
# Fused multi-level anchor generation (single pallas_call).
# ----------------------------------------------------------------------------
_MAX_TQ = 16 * 1024            # max locations (lanes) per block
_MAX_BLOCK_BYTES = 2 << 20     # cap on the output block size (double-buffered)


def _fused_grid_anchors(grid_sizes, strides, cell_anchors, offset):
    """Returns a list of (Hi*Wi*A, 4) float32 anchors (PyTorch ordering).

    Requires every level to have the same number of cell anchors A."""
    num_levels = len(grid_sizes)
    A = int(cell_anchors[0].shape[0])
    a4 = A * 4

    # Tiny per-location shift rows (sx, sy, level_id) -- no int div in-kernel.
    rows = []
    hws = []
    for l, ((H, W), stride) in enumerate(zip(grid_sizes, strides)):
        H, W = int(H), int(W)
        hw = H * W
        hws.append(hw)
        xs = (jnp.arange(W, dtype=jnp.float32) + offset) * float(stride)
        ys = (jnp.arange(H, dtype=jnp.float32) + offset) * float(stride)
        sx = jnp.tile(xs, H)             # loc = y*W + x  ->  xs[x]
        sy = jnp.repeat(ys, W)           # loc = y*W + x  ->  ys[y]
        lvl = jnp.full((hw,), float(l), dtype=jnp.float32)
        rows.append(jnp.stack([sx, sy, lvl], axis=0))
    shift_all = jnp.concatenate(rows, axis=1)                # (3, total)
    total = int(sum(hws))

    # Fixed 128-multiple lane tile, byte-capped; pad total to an exact
    # multiple of the tile so every block is full-size (no ragged writeback).
    max_tq = max(128, min(_MAX_TQ, (_MAX_BLOCK_BYTES // (a4 * 4)) // 128 * 128))
    tq = min(max_tq, _round_up(total, 128))
    padded_total = _round_up(total, tq)
    if padded_total > total:
        shift_all = jnp.pad(shift_all, ((0, 0), (0, padded_total - total)))
    num_blocks = padded_total // tq

    bases = jnp.stack([c.reshape(a4) for c in cell_anchors], axis=0)
    bases = bases.astype(jnp.float32)[..., None]             # (L, a4, 1)

    kernel = functools.partial(_anchor_kernel, num_levels=num_levels)

    out = pl.pallas_call(
        kernel,
        out_shape=jax.ShapeDtypeStruct((a4, padded_total), jnp.float32),
        grid=(num_blocks,),
        in_specs=[
            pl.BlockSpec((3, tq), lambda i: (0, i)),
            pl.BlockSpec((num_levels, a4, 1), lambda i: (0, 0, 0)),
        ],
        out_specs=pl.BlockSpec((a4, tq), lambda i: (0, i)),
        compiler_params=pltpu.CompilerParams(
            dimension_semantics=("parallel",),
            vmem_limit_bytes=32 * 1024 * 1024),
        cost_estimate=pl.CostEstimate(
            flops=2 * a4 * padded_total,
            transcendentals=0,
            bytes_accessed=(a4 + 3) * padded_total * 4 + num_levels * a4 * 4),
    )(shift_all, bases)

    # Wrapper-side layout plumbing to honor the module's (H*W*A, 4) contract.
    # (Downstream consumers that can accept the lane-dense (A*4, H*W) slab
    #  should take `out` directly and skip this transpose.)
    anchors = []
    off = 0
    for hw in hws:
        lvl_out = out[:, off:off + hw]                       # (a4, hw)
        anchors.append(lvl_out.T.reshape(hw * A, 4))
        off += hw
    return anchors


# ----------------------------------------------------------------------------
# Module wrapper: DefaultAnchorGenerator.forward
# ----------------------------------------------------------------------------
class DefaultAnchorGeneratorPallas:
    box_dim = 4

    def __init__(self, cell_anchors, strides, offset):
        self.cell_anchors = [jnp.asarray(c, dtype=jnp.float32)
                             for c in cell_anchors]
        self.strides = list(strides)
        self.offset = float(offset)

    @property
    def num_anchors(self):
        return [int(c.shape[0]) for c in self.cell_anchors]

    def __call__(self, features):
        # features: list of NCHW arrays; only H, W are consumed.
        grid_sizes = [tuple(int(d) for d in f.shape[-2:]) for f in features]
        num_a = {int(c.shape[0]) for c in self.cell_anchors}
        if len(num_a) == 1:
            # Standard FPN/RPN case: one fused launch for all levels.
            return _fused_grid_anchors(grid_sizes, self.strides,
                                       self.cell_anchors, self.offset)
        # Uncommon case (different A per level): one launch per level.
        anchors = []
        for gs, s, c in zip(grid_sizes, self.strides, self.cell_anchors):
            anchors.append(_fused_grid_anchors([gs], [s], [c], self.offset)[0])
        return anchors


# ----------------------------------------------------------------------------
# Pure-JAX reference (mirrors the PyTorch code path exactly)
# ----------------------------------------------------------------------------
def reference_anchors(H, W, stride, offset, base_anchors):
    shifts_x = jnp.arange(offset * stride, W * stride, step=stride,
                          dtype=jnp.float32)
    shifts_y = jnp.arange(offset * stride, H * stride, step=stride,
                          dtype=jnp.float32)
    shift_y, shift_x = jnp.meshgrid(shifts_y, shifts_x, indexing="ij")
    shift_x = shift_x.reshape(-1)
    shift_y = shift_y.reshape(-1)
    shifts = jnp.stack((shift_x, shift_y, shift_x, shift_y), axis=1)
    return (shifts.reshape(-1, 1, 4)
            + base_anchors.reshape(1, -1, 4)).reshape(-1, 4)


if __name__ == "__main__":
    key = jax.random.PRNGKey(0)
    k1, k2 = jax.random.split(key)

    # Two feature levels, NCHW.
    feat0 = jax.random.normal(k1, (2, 4, 16, 16), dtype=jnp.float32)
    feat1 = jax.random.normal(k2, (2, 4, 8, 8), dtype=jnp.float32)
    features = [feat0, feat1]

    strides = [4, 8]
    offset = 0.5
    aspect_ratios = (0.5, 1.0, 2.0)
    cell_anchors = [
        generate_cell_anchors((32, 64), aspect_ratios),   # A = 6
        generate_cell_anchors((64, 128), aspect_ratios),  # A = 6
    ]

    gen = DefaultAnchorGeneratorPallas(cell_anchors, strides, offset)
    outs = gen(features)
    outs = [jax.block_until_ready(o) for o in outs]

    # Validate against pure-JAX reference of the PyTorch semantics.
    for f, stride, base, out in zip(features, strides, cell_anchors, outs):
        H, W = f.shape[-2:]
        ref = reference_anchors(H, W, stride, offset, base)
        assert out.shape == ref.shape, (out.shape, ref.shape)
        assert out.dtype == jnp.float32
        assert jnp.allclose(out, ref, atol=1e-4, rtol=1e-5)

    print("KERNEL_OK")
</pallas_src>

<mosaic_0001>
module attributes {stable_mosaic.version = 11 : i64} {
  func.func @_anchor_kernel(%arg0: i32, %arg1: memref<3x384xf32, #tpu.memory_space<vmem>>, %arg2: memref<2x24x1xf32, #tpu.memory_space<vmem>>, %arg3: memref<24x384xf32, #tpu.memory_space<vmem>>) attributes {dimension_semantics = [#tpu.dimension_semantics<parallel>], iteration_bounds = array<i64: 1>, scalar_prefetch = 0 : i64, scratch_operands = 0 : i64, tpu.core_type = #tpu.core_type<tc>, window_params = [{transform_indices = @transform_0, window_bounds = array<i64: 3, 384>}, {pipeline_mode = #tpu.pipeline_mode<synchronous>, transform_indices = @transform_1, window_bounds = array<i64: 2, 24, 1>}, {transform_indices = @transform_2, window_bounds = array<i64: 24, 384>}]} {
    %c0 = arith.constant 0 : index
    %c0_0 = arith.constant 0 : index
    %0 = vector.load %arg1[%c0, %c0_0] : memref<3x384xf32, #tpu.memory_space<vmem>>, vector<1x384xf32>
    %c1 = arith.constant 1 : index
    %c0_1 = arith.constant 0 : index
    %1 = vector.load %arg1[%c1, %c0_1] : memref<3x384xf32, #tpu.memory_space<vmem>>, vector<1x384xf32>
    %2 = tpu.iota {dimensions = array<i32: 0>} : vector<24x384xi32>
    %c2_i32 = arith.constant 2 : i32
    %c0_i32 = arith.constant 0 : i32
    %3 = arith.cmpi eq, %c2_i32, %c0_i32 : i32
    %c1_i32 = arith.constant 1 : i32
    %4 = arith.select %3, %c1_i32, %c2_i32 : i32
    %5 = vector.broadcast %4 : i32 to vector<24x384xi32>
    %6 = arith.remsi %2, %5 : vector<24x384xi32>
    %c0_i32_2 = arith.constant 0 : i32
    %7 = vector.broadcast %c0_i32_2 : i32 to vector<24x384xi32>
    %8 = arith.cmpi ne, %6, %7 : vector<24x384xi32>
    %c0_i32_3 = arith.constant 0 : i32
    %9 = vector.broadcast %c0_i32_3 : i32 to vector<24x384xi32>
    %10 = arith.cmpi slt, %6, %9 : vector<24x384xi32>
    %c0_i32_4 = arith.constant 0 : i32
    %11 = arith.cmpi slt, %4, %c0_i32_4 : i32
    %12 = vector.broadcast %11 : i1 to vector<24x384xi1>
    %13 = vector.broadcast %12 : vector<24x384xi1> to vector<24x384xi1>
    %14 = arith.xori %10, %13 : vector<24x384xi1>
    %15 = arith.andi %14, %8 : vector<24x384xi1>
    %16 = vector.broadcast %4 : i32 to vector<24x384xi32>
    %17 = arith.addi %6, %16 : vector<24x384xi32>
    %18 = arith.select %15, %17, %6 : vector<24x384xi1>, vector<24x384xi32>
    %c0_i32_5 = arith.constant 0 : i32
    %19 = vector.broadcast %c0_i32_5 : i32 to vector<24x384xi32>
    %20 = arith.cmpi eq, %18, %19 : vector<24x384xi32>
    %21 = vector.shape_cast %0 : vector<1x384xf32> to vector<1x384xf32>
    %22 = vector.broadcast %21 : vector<1x384xf32> to vector<24x384xf32>
    %23 = vector.shape_cast %1 : vector<1x384xf32> to vector<1x384xf32>
    %24 = vector.broadcast %23 : vector<1x384xf32> to vector<24x384xf32>
    %25 = arith.select %20, %22, %24 : vector<24x384xi1>, vector<24x384xf32>
    %c0_6 = arith.constant 0 : index
    %c0_7 = arith.constant 0 : index
    %c0_8 = arith.constant 0 : index
    %26 = vector.load %arg2[%c0_6, %c0_7, %c0_8] : memref<2x24x1xf32, #tpu.memory_space<vmem>>, vector<1x24x1xf32>
    %27 = vector.shape_cast %26 : vector<1x24x1xf32> to vector<24x1xf32>
    %c2 = arith.constant 2 : index
    %c0_9 = arith.constant 0 : index
    %28 = vector.load %arg1[%c2, %c0_9] : memref<3x384xf32, #tpu.memory_space<vmem>>, vector<1x384xf32>
    %29 = vector.shape_cast %28 : vector<1x384xf32> to vector<1x384xf32>
    %30 = vector.broadcast %29 : vector<1x384xf32> to vector<24x384xf32>
    %cst = arith.constant 1.000000e+00 : f32
    %31 = vector.broadcast %cst : f32 to vector<24x384xf32>
    %32 = arith.cmpf oeq, %30, %31 : vector<24x384xf32>
    %c1_10 = arith.constant 1 : index
    %c0_11 = arith.constant 0 : index
    %c0_12 = arith.constant 0 : index
    %33 = vector.load %arg2[%c1_10, %c0_11, %c0_12] : memref<2x24x1xf32, #tpu.memory_space<vmem>>, vector<1x24x1xf32>
    %34 = vector.shape_cast %33 : vector<1x24x1xf32> to vector<24x1xf32>
    %35 = vector.shape_cast %34 : vector<24x1xf32> to vector<24x1xf32>
    %36 = vector.broadcast %35 : vector<24x1xf32> to vector<24x384xf32>
    %37 = vector.shape_cast %27 : vector<24x1xf32> to vector<24x1xf32>
    %38 = vector.broadcast %37 : vector<24x1xf32> to vector<24x384xf32>
    %39 = arith.select %32, %36, %38 : vector<24x384xi1>, vector<24x384xf32>
    %40 = arith.addf %25, %39 : vector<24x384xf32>
    %c0_13 = arith.constant 0 : index
    %c0_14 = arith.constant 0 : index
    %41 = vector.load %arg3[%c0_13, %c0_14] : memref<24x384xf32, #tpu.memory_space<vmem>>, vector<24x384xf32>
    tpu.vector_store %arg3[%c0_13, %c0_14], %40 {strides = array<i32>} : memref<24x384xf32, #tpu.memory_space<vmem>>, vector<24x384xf32>,
    return
  }
  func.func @transform_0(%arg0: i32) -> (i32, i32) {
    %c0_i32 = arith.constant 0 : i32
    %c0_i32_0 = arith.constant 0 : i32
    return %c0_i32, %arg0 : i32, i32
  }
  func.func @transform_1(%arg0: i32) -> (i32, i32, i32) {
    %c0_i32 = arith.constant 0 : i32
    %c0_i32_0 = arith.constant 0 : i32
    %c0_i32_1 = arith.constant 0 : i32
    %c0_i32_2 = arith.constant 0 : i32
    return %c0_i32, %c0_i32_0, %c0_i32_1 : i32, i32, i32
  }
  func.func @transform_2(%arg0: i32) -> (i32, i32) {
    %c0_i32 = arith.constant 0 : i32
    %c0_i32_0 = arith.constant 0 : i32
    return %c0_i32, %arg0 : i32, i32
  }
}

</mosaic_0001>

<bundles_post_ra>
// kernel: tpu_custom_call.1
= control target key start
LH: loop header
LB: loop body
LE: loop exit
PB: predicated region body
PF: predicated region fallthrough
CT: control target
= control target key end

     0   :  { %v213_v2 = vmov 0   ;;  %s322_s0 = inlined_call_operand.vmem [shape: f32[3,384], index: 0, kind: input, shape index: {}]   ;;  %s323_s1 = inlined_call_operand.vmem [shape: f32[2,24,1], index: 1, kind: input, shape index: {}]   ;;  %s324_s2 = inlined_call_operand.hbm [shape: f32[24,384], index: 2, kind: output, shape index: {}]  }
   0x1   :  { %v179_v0 = vld [vmem:[%s323_s1 + $0x28] sm:$0xff]  ;;  %v177_v1 = vld [vmem:[%s323_s1 + $0x18] sm:$0xff]  ;;  %185 = vset.pattern.permute.xlu1 %v213_v2  ;;  %184 = vset.pattern.permute.xlu0 %v213_v2 }
   0x2   :  { %v82_v3 = vld [vmem:[%s323_s1 + $0x8] sm:$0xff]  ;;  %112 = vperm.xlu1 %185, %v179_v0   ;;  %102 = vperm.xlu0 %184, %v177_v1  }
   0x3   :  { %7 = vsyncpa [#allocation3], 0  ;;  %186 = vset.pattern.permute.xlu2 %v213_v2  ;;  %v178_v4 = vld [vmem:[%s323_s1 + $0x20] sm:$0xff]  ;;  %v83_v6 = vld [vmem:[%s323_s1 + $0x10] sm:$0xff]  ;;  %v15_v7 = vlaneseq  ;;  %s163_s29 = sshll.u32 %s324_s2, 4  ;;  %s215_s30 = smov 384   ;;  %s164_s29 = int_to_ptr.hbm [resolvable:$true] %s163_s29 }
   0x4   :  { %122 = vperm.xlu2 %186, %v82_v3   ;;  %v81_v5 = vld [vmem:[%s323_s1] sm:$0xff]  ;;  %s216_s3 = smov 24  }
   0x5   :  { %v16_v8 = vshrl.u32 %v15_v7, 7  ;;  %v176_v11 = vld [vmem:[%s322_s0 + $0x2] ss:$4 sm:$0x7] }
   0x6   :  { %v12_v12 = vld [vmem:[%s322_s0] ss:$4 sm:$0x7]  ;;  %v175_v13 = vld [vmem:[%s322_s0 + $0x1] ss:$4 sm:$0x7] }
   0x7   :  { %v18_v10 = vadd.s32 16, %v16_v8  ;;  %v87_v15 = vperm.slane %v176_v11, 0  ;;  %v88_v16 = vperm.slane %v176_v11, 1  ;;  %v89_v17 = vperm.slane %v176_v11, 2  ;;  %s214_s0 = smov [#allocation2]  }
   0x8   :  { %v59_v18 = vperm.slane %v12_v12, 0  ;;  %v60_v19 = vperm.slane %v12_v12, 1  ;;  %v61_v20 = vperm.slane %v12_v12, 2  ;;  %v66_v21 = vperm.slane %v175_v13, 0  ;;  %s161_s1 = sshll.u32 %s214_s0, 4  ;;  %s162_s1 = int_to_ptr.vmem [resolvable:$true] %s161_s1 }
   0x9   :  { %v37_v14 = vand.u32 1, %v18_v10  ;;  %v67_v22 = vperm.slane %v175_v13, 1  ;;  %v68_v23 = vperm.slane %v175_v13, 2  ;;  %v17_v25 = vadd.s32 8, %v16_v8 }
   0xa   :  { %107 = vperm.xlu0 %184, %v178_v4   ;;  %117 = vperm.xlu1 %185, %v81_v5   ;;  %vm263_vm1 = vcmp.eq.f32.partialorder %v87_v15, 1.0  ;;  %vm267_vm2 = vcmp.eq.f32.partialorder %v88_v16, 1.0  ;;  %vm271_vm3 = vcmp.eq.f32.partialorder %v89_v17, 1.0  ;;  %v23_v39 = vand.u32 1, %v16_v8 }
   0xb   :  { %vm259_vm0 = vcmp.eq.s32.totalorder %v37_v14, 0  ;;  %v30_v35 = vand.u32 1, %v17_v25 }
   0xc   :  { %127 = vperm.xlu2 %186, %v83_v6   ;;  %v78_v30 = vsel %vm259_vm0, %v59_v18, %v66_v21  ;;  %v79_v31 = vsel %vm259_vm0, %v60_v19, %v67_v22  ;;  %v80_v32 = vsel %vm259_vm0, %v61_v20, %v68_v23  ;;  %vm291_vm5 = vcmp.eq.s32.totalorder %v23_v39, 0 }
   0xd   :  { %vm287_vm4 = vcmp.eq.s32.totalorder %v30_v35, 0  ;;  %v72_v50 = vsel %vm291_vm5, %v59_v18, %v66_v21  ;;  %v73_v51 = vsel %vm291_vm5, %v60_v19, %v67_v22  ;;  %v74_v52 = vsel %vm291_vm5, %v61_v20, %v68_v23 }
   0xe   :  { %v75_v45 = vsel %vm287_vm4, %v59_v18, %v66_v21  ;;  %v76_v46 = vsel %vm287_vm4, %v60_v19, %v67_v22  ;;  %v77_v47 = vsel %vm287_vm4, %v61_v20, %v68_v23 }
  0x5e   :  { %v123_v9 = vpop.permute.xlu2 %122 }
  0x66   :  { %v128_v29 = vpop.permute.xlu2 %127 }
  0x74   :  { %v113_v33 = vpop.permute.xlu1 %112  ;;  %v103_v34 = vpop.permute.xlu0 %102 }
  0x75   :  { %v136_v36 = vsel %vm263_vm1, %v113_v33, %v128_v29  ;;  %v137_v37 = vsel %vm267_vm2, %v113_v33, %v128_v29  ;;  %v138_v38 = vsel %vm271_vm3, %v113_v33, %v128_v29 }
  0x76   :  { %v145_v40 = vadd.f32 %v136_v36, %v78_v30  ;;  %v146_v41 = vadd.f32 %v137_v37, %v79_v31  ;;  %v147_v42 = vadd.f32 %v138_v38, %v80_v32 }
  0x78   :  { %154 = vst [vmem:[#allocation2 + $0x30] sm:$0xff] %v145_v40 }
  0x79   :  { %155 = vst [vmem:[#allocation2 + $0x38] sm:$0xff] %v146_v41 }
  0x7a   :  { %156 = vst [vmem:[#allocation2 + $0x40] sm:$0xff] %v147_v42 }
  0x7c   :  { %v108_v48 = vpop.permute.xlu0 %107  ;;  %v118_v49 = vpop.permute.xlu1 %117 }
  0x7d   :  { %v133_v53 = vsel %vm263_vm1, %v108_v48, %v123_v9  ;;  %v134_v54 = vsel %vm267_vm2, %v108_v48, %v123_v9  ;;  %v135_v55 = vsel %vm271_vm3, %v108_v48, %v123_v9  ;;  %v130_v56 = vsel %vm263_vm1, %v103_v34, %v118_v49 }
  0x7e   :  { %v142_v57 = vadd.f32 %v133_v53, %v75_v45  ;;  %v143_v58 = vadd.f32 %v134_v54, %v76_v46  ;;  %v144_v59 = vadd.f32 %v135_v55, %v77_v47  ;;  %v131_v60 = vsel %vm267_vm2, %v103_v34, %v118_v49 }
  0x7f   :  { %v132_v61 = vsel %vm271_vm3, %v103_v34, %v118_v49  ;;  %v139_v62 = vadd.f32 %v130_v56, %v72_v50  ;;  %v140_v63 = vadd.f32 %v131_v60, %v73_v51 }
  0x80   :  { %151 = vst [vmem:[#allocation2 + $0x18] sm:$0xff] %v142_v57  ;;  %v141_v0 = vadd.f32 %v132_v61, %v74_v52 }
  0x81   :  { %152 = vst [vmem:[#allocation2 + $0x20] sm:$0xff] %v143_v58 }
  0x82   :  { %153 = vst [vmem:[#allocation2 + $0x28] sm:$0xff] %v144_v59 }
  0x83   :  { %148 = vst [vmem:[#allocation2] sm:$0xff] %v139_v62 }
  0x84   :  { %149 = vst [vmem:[#allocation2 + $0x8] sm:$0xff] %v140_v63 }
  0x85   :  { %150 = vst [vmem:[#allocation2 + $0x10] sm:$0xff] %v141_v0 }
  0x86   :  { %169 = dma.vmem_to_hbm [thread:$0]  %s162_s1, 1152, %s164_s29, [#allocation3], %s215_s30, %s215_s30, %s216_s3  }
  0x87   :  { %211 = dma.done.wait [#allocation3], 1152  }
  0x88   :  { %212 = vsyncadd [#allocation3], 4294966144 }
  0x89   :  { %174 = vsyncpa [#allocation3], 1 }

</bundles_post_ra>
